<compile_context>
chip_gen: v5e
topology: v5e:2x2
jax: 0.10.0
libtpu: 0.0.40
codegen_flags: <defaults>
</compile_context>

<pallas_src>
import functools

import jax
import jax.numpy as jnp
from jax import lax
from jax.experimental import pallas as pl
from jax.experimental.pallas import tpu as pltpu

EPS = 1e-5


def _round_up(n, m):
    return (n + m - 1) // m * m


def _vmem_capacity_bytes():
    """Physical VMEM per TensorCore (used to size blocks / vmem limit)."""
    try:
        cap = int(pltpu.get_tpu_info().vmem_capacity_bytes)
        if cap > 0:
            return cap
    except Exception:
        pass
    return 64 * 1024 * 1024  # conservative default: v7x per-core VMEM


def _pick_row_tile(bc, hw_pad, itemsize, target_f32_bytes):
    """Rows per block: multiple of the sublane minimum, sized from an f32
    working-set budget, keeping >= 4 grid steps when possible (pipelining and
    v7x 2-TensorCore sharding) and preferring an even step count when that
    doesn't shrink the tile below ~half the budgeted size."""
    min_tr = {1: 32, 2: 16}.get(itemsize, 8)
    cap = max(min_tr, (target_f32_bytes // (hw_pad * 4)) // min_tr * min_tr)
    if bc >= 4 * min_tr:                       # keep >= 4 grid steps
        cap = min(cap, max(min_tr, (bc // 4) // min_tr * min_tr))
    cap = min(cap, _round_up(bc, min_tr))      # never exceed the row count
    tr = cap
    lo = max(min_tr, (cap // 2) // min_tr * min_tr)
    t = cap
    while t >= lo:                             # prefer an even number of steps
        if (-(-bc // t)) % 2 == 0:
            tr = t
            break
        t -= min_tr
    return tr


def _adain_kernel(x_ref, w_ref, b_ref, o_ref, *, hw_true):
    # x_ref / o_ref: (TR, HW_pad) block.  w_ref / b_ref: (TR, 1) blocks.
    x = x_ref[...].astype(jnp.float32)
    w = w_ref[...].astype(jnp.float32)
    b = b_ref[...].astype(jnp.float32)

    hw_pad = x.shape[1]
    inv_n = 1.0 / float(hw_true)

    if hw_pad != hw_true:
        # Single (1, HW_pad) lane-mask row, broadcast over sublanes.  jnp.where
        # is a select, so stale/NaN contents of partial-block pad lanes are safe.
        valid = lax.broadcasted_iota(jnp.int32, (1, hw_pad), 1) < hw_true
        xm = jnp.where(valid, x, 0.0)
    else:
        xm = x

    mu = jnp.sum(xm, axis=1, keepdims=True) * inv_n           # per-instance mean
    xc = xm - mu                                              # pad lanes -> -mu (finite)
    # sum((x - mu) * x) equals sum((x - mu)^2) when mu is the row mean, and
    # xc * xm is identically 0 in the pad lanes -> no second masking pass.
    var = jnp.maximum(jnp.sum(xc * xm, axis=1, keepdims=True) * inv_n, 0.0)
    gain = lax.rsqrt(var + EPS) * w                           # (TR, 1)
    # Reuse the already-centered block: out = (x - mu) * gain + b.
    # Out-of-range lanes/rows of partial blocks are dropped by Pallas' writeback
    # masking, so their (finite) garbage values never reach HBM.
    o_ref[...] = (xc * gain + b).astype(o_ref.dtype)


@jax.jit
def adaptive_instance_norm_2d(x, weight, bias):
    """x: (B, C, H, W); weight, bias: (B*C,).  Returns (B, C, H, W)."""
    b, c, h, w = x.shape
    bc, hw = b * c, h * w
    assert weight.shape == (bc,) and bias.shape == (bc,)

    itemsize = jnp.dtype(x.dtype).itemsize
    hw_pad = _round_up(hw, 128)              # lane-aligned block width

    vmem_phys = _vmem_capacity_bytes()
    # v5e/v6e (128 MiB VMEM): large blocks amortize the ~0.35us/step overhead on
    # this HBM-bound kernel.  v7x (64 MiB): keep blocks modest so 2x(in)+2x(out)
    # blocks plus ~3 f32 block-sized temporaries fit with headroom.
    target_f32 = (8 << 20) if vmem_phys >= (100 << 20) else (4 << 20)
    tr = _pick_row_tile(bc, hw_pad, itemsize, target_f32)
    steps = -(-bc // tr)
    bc_pad = steps * tr
    # TODO(synk): very large H*W (a single row block exceeding the VMEM budget)
    #             would need a spatial-chunked two-pass (sum/sumsq) variant.

    # x is passed UNPADDED: no host-side pad / post-slice HBM passes.
    x2 = x.reshape(bc, hw)
    w2 = weight.reshape(bc, 1).astype(jnp.float32)
    b2 = bias.reshape(bc, 1).astype(jnp.float32)
    if bc_pad != bc:                         # tiny (bc, 1) pads only
        w2 = jnp.pad(w2, ((0, bc_pad - bc), (0, 0)))
        b2 = jnp.pad(b2, ((0, bc_pad - bc), (0, 0)))

    # VMEM budget: double-buffered in + out blocks, ~3 f32 block temporaries.
    x_blk = tr * hw_pad * itemsize
    f32_blk = tr * hw_pad * 4
    vmem_need = 4 * x_blk + 3 * f32_blk + (2 << 20)
    vmem_limit = int(min(max(vmem_need, 32 << 20), vmem_phys - (16 << 20)))

    kernel = functools.partial(_adain_kernel, hw_true=hw)

    out2 = pl.pallas_call(
        kernel,
        out_shape=jax.ShapeDtypeStruct((bc, hw), x.dtype),
        grid_spec=pltpu.PrefetchScalarGridSpec(
            num_scalar_prefetch=0,
            grid=(steps,),
            in_specs=[
                pl.BlockSpec((tr, hw_pad), lambda i: (i, 0)),
                pl.BlockSpec((tr, 1), lambda i: (i, 0)),
                pl.BlockSpec((tr, 1), lambda i: (i, 0)),
            ],
            out_specs=pl.BlockSpec((tr, hw_pad), lambda i: (i, 0)),
        ),
        compiler_params=pltpu.CompilerParams(
            dimension_semantics=("parallel",),
            vmem_limit_bytes=vmem_limit,
        ),
    )(x2, w2, b2)

    return out2.reshape(b, c, h, w)


def _reference(x, weight, bias):
    b, c, h, w = x.shape
    xf = x.reshape(b * c, h * w).astype(jnp.float32)
    mu = jnp.mean(xf, axis=1, keepdims=True)
    var = jnp.mean((xf - mu) ** 2, axis=1, keepdims=True)
    out = (xf - mu) / jnp.sqrt(var + EPS)
    out = out * weight[:, None] + bias[:, None]
    return out.reshape(b, c, h, w).astype(x.dtype)


if __name__ == "__main__":
    B, C, H, W = 2, 4, 16, 16
    num_features = C  # module's __init__ arg

    key = jax.random.PRNGKey(0)
    kx, kw, kb = jax.random.split(key, 3)
    x = jax.random.normal(kx, (B, C, H, W), dtype=jnp.float32)
    # weight/bias are assigned externally before calling AdaIN; shape (B*C,)
    weight = jax.random.normal(kw, (B * C,), dtype=jnp.float32)
    bias = jax.random.normal(kb, (B * C,), dtype=jnp.float32)

    out = adaptive_instance_norm_2d(x, weight, bias)
    out = jax.block_until_ready(out)

    ref = _reference(x, weight, bias)
    assert out.shape == (B, C, H, W)
    assert jnp.allclose(out, ref, atol=1e-4, rtol=1e-4), "mismatch vs reference"

    print("KERNEL_OK")
</pallas_src>

<mosaic_0001>
module attributes {stable_mosaic.version = 11 : i64} {
  func.func @_adain_kernel(%arg0: i32, %arg1: memref<8x256xf32, #tpu.memory_space<vmem>>, %arg2: memref<8x1xf32, #tpu.memory_space<vmem>>, %arg3: memref<8x1xf32, #tpu.memory_space<vmem>>, %arg4: memref<8x256xf32, #tpu.memory_space<vmem>>) attributes {dimension_semantics = [#tpu.dimension_semantics<parallel>], iteration_bounds = array<i64: 1>, scalar_prefetch = 0 : i64, scratch_operands = 0 : i64, tpu.core_type = #tpu.core_type<tc>, window_params = [{transform_indices = @transform_0, window_bounds = array<i64: 8, 256>}, {transform_indices = @transform_1, window_bounds = array<i64: 8, 1>}, {transform_indices = @transform_2, window_bounds = array<i64: 8, 1>}, {transform_indices = @transform_3, window_bounds = array<i64: 8, 256>}]} {
    %c0 = arith.constant 0 : index
    %c0_0 = arith.constant 0 : index
    %0 = vector.load %arg1[%c0, %c0_0] : memref<8x256xf32, #tpu.memory_space<vmem>>, vector<8x256xf32>
    %c0_1 = arith.constant 0 : index
    %c0_2 = arith.constant 0 : index
    %1 = vector.load %arg2[%c0_1, %c0_2] : memref<8x1xf32, #tpu.memory_space<vmem>>, vector<8x1xf32>
    %c0_3 = arith.constant 0 : index
    %c0_4 = arith.constant 0 : index
    %2 = vector.load %arg3[%c0_3, %c0_4] : memref<8x1xf32, #tpu.memory_space<vmem>>, vector<8x1xf32>
    %cst = arith.constant dense<0.000000e+00> : vector<8xf32>
    %3 = vector.multi_reduction <add>, %0, %cst [1] : vector<8x256xf32> to vector<8xf32>
    %4 = vector.shape_cast %3 : vector<8xf32> to vector<8x1xf32>
    %cst_5 = arith.constant 3.906250e-03 : f32
    %5 = vector.broadcast %cst_5 : f32 to vector<8x1xf32>
    %6 = arith.mulf %4, %5 : vector<8x1xf32>
    %7 = vector.broadcast %6 : vector<8x1xf32> to vector<8x256xf32>
    %8 = arith.subf %0, %7 : vector<8x256xf32>
    %9 = arith.mulf %8, %0 : vector<8x256xf32>
    %cst_6 = arith.constant dense<0.000000e+00> : vector<8xf32>
    %10 = vector.multi_reduction <add>, %9, %cst_6 [1] : vector<8x256xf32> to vector<8xf32>
    %11 = vector.shape_cast %10 : vector<8xf32> to vector<8x1xf32>
    %cst_7 = arith.constant 3.906250e-03 : f32
    %12 = vector.broadcast %cst_7 : f32 to vector<8x1xf32>
    %13 = arith.mulf %11, %12 : vector<8x1xf32>
    %cst_8 = arith.constant 0.000000e+00 : f32
    %14 = vector.broadcast %cst_8 : f32 to vector<8x1xf32>
    %15 = arith.maximumf %13, %14 : vector<8x1xf32>
    %cst_9 = arith.constant 9.99999974E-6 : f32
    %16 = vector.broadcast %cst_9 : f32 to vector<8x1xf32>
    %17 = arith.addf %15, %16 : vector<8x1xf32>
    %18 = math.rsqrt %17 : vector<8x1xf32>
    %19 = arith.mulf %18, %1 : vector<8x1xf32>
    %20 = vector.broadcast %19 : vector<8x1xf32> to vector<8x256xf32>
    %21 = arith.mulf %8, %20 : vector<8x256xf32>
    %22 = vector.broadcast %2 : vector<8x1xf32> to vector<8x256xf32>
    %23 = arith.addf %21, %22 : vector<8x256xf32>
    %c0_10 = arith.constant 0 : index
    %c0_11 = arith.constant 0 : index
    %24 = vector.load %arg4[%c0_10, %c0_11] : memref<8x256xf32, #tpu.memory_space<vmem>>, vector<8x256xf32>
    tpu.vector_store %arg4[%c0_10, %c0_11], %23 {strides = array<i32>} : memref<8x256xf32, #tpu.memory_space<vmem>>, vector<8x256xf32>,
    return
  }
  func.func @transform_0(%arg0: i32) -> (i32, i32) {
    %c0_i32 = arith.constant 0 : i32
    %c0_i32_0 = arith.constant 0 : i32
    return %arg0, %c0_i32 : i32, i32
  }
  func.func @transform_1(%arg0: i32) -> (i32, i32) {
    %c0_i32 = arith.constant 0 : i32
    %c0_i32_0 = arith.constant 0 : i32
    return %arg0, %c0_i32 : i32, i32
  }
  func.func @transform_2(%arg0: i32) -> (i32, i32) {
    %c0_i32 = arith.constant 0 : i32
    %c0_i32_0 = arith.constant 0 : i32
    return %arg0, %c0_i32 : i32, i32
  }
  func.func @transform_3(%arg0: i32) -> (i32, i32) {
    %c0_i32 = arith.constant 0 : i32
    %c0_i32_0 = arith.constant 0 : i32
    return %arg0, %c0_i32 : i32, i32
  }
}

</mosaic_0001>

<bundles_post_ra>
// kernel: adaptive_instance_norm_2d.1
= control target key start
LH: loop header
LB: loop body
LE: loop exit
PB: predicated region body
PF: predicated region fallthrough
CT: control target
= control target key end

     0   :  { %v68_v10 = vmov 0   ;;  %s107_s0 = inlined_call_operand.vmem [shape: f32[8,256], index: 0, kind: input, shape index: {}]   ;;  %s108_s1 = inlined_call_operand.vmem [shape: f32[8,1], index: 1, kind: input, shape index: {}]   ;;  %s109_s2 = inlined_call_operand.vmem [shape: f32[8,1], index: 2, kind: input, shape index: {}]   ;;  %s110_s3 = inlined_call_operand.vmem [shape: f32[8,256], index: 3, kind: output, shape index: {}]  }
   0x1   :  { %v14_v0 = vld [vmem:[%s107_s0] sm:$0xff]  ;;  %v15_v1 = vld [vmem:[%s107_s0 + $0x8] sm:$0xff]  ;;  %64 = vset.pattern.permute.xlu1 %v68_v10  ;;  %65 = vset.pattern.permute.xlu0 %v68_v10 }
   0x2   :  { %v18_v2 = vadd.f32 %v15_v1, %v14_v0  ;;  %v16_v20 = vld [vmem:[%s108_s1] sm:$0xff] }
   0x3   :  { %v17_v24 = vld [vmem:[%s109_s2] sm:$0xff] }
   0x4   :  { %19 = vadd.xlane.f32.xlu0 %v18_v2 }
  0x77   :  { %v20_v3 = vpop.xlane.xlu0 %19 }
  0x78   :  { %v21_v4 = vmul.f32 0.00390625, %v20_v3 }
  0x7a   :  { %v22_v5 = vsub.f32 %v14_v0, %v21_v4  ;;  %v23_v6 = vsub.f32 %v15_v1, %v21_v4 }
  0x7c   :  { %v24_v7 = vmul.f32 %v22_v5, %v14_v0  ;;  %v25_v8 = vmul.f32 %v23_v6, %v15_v1 }
  0x7e   :  { %v26_v9 = vadd.f32 %v25_v8, %v24_v7 }
  0x80   :  { %27 = vadd.xlane.f32.xlu0 %v26_v9 }
  0xf3   :  { %v28_v11 = vpop.xlane.xlu0 %27 }
  0xf4   :  { %v29_v12 = vmul.f32 0.00390625, %v28_v11 }
  0xf6   :  { %v30_v13 = vmax.f32 %v29_v12, 0.0 }
  0xf8   :  { %v31_v14 = vadd.f32 1e-05, %v30_v13 }
  0xfa   :  { %66 = vrsqrt.f32 %v31_v14  ;;  %vm38_vm1 = vweird.f32 %v31_v14 }
 0x100   :  { %v67_v15 = vpop.eup %66 }
 0x101   :  { %v33_v16 = vmul.f32 %v67_v15, %v31_v14  ;;  %vm39_vm0 = vweird.f32 %v67_v15 }
 0x102   :  { %vm40_vm2 = vmor %vm38_vm1, %vm39_vm0 }
 0x103   :  { %v34_v17 = vmul.f32 %v67_v15, %v33_v16 }
 0x105   :  { %v35_v18 = vmul.f32 0.5, %v34_v17 }
 0x107   :  { %v36_v19 = vsub.f32 1.5, %v35_v18 }
 0x109   :  { %v37_v21 = vmul.f32 %v67_v15, %v36_v19 }
 0x10b   :  { %v41_v22 = vsel %vm40_vm2, %v67_v15, %v37_v21 }
 0x10c   :  { %v42_v23 = vmul.f32 %v41_v22, %v16_v20 }
 0x10e   :  { %45 = vperm.xlu1 %64, %v42_v23  }
 0x116   :  { %52 = vperm.xlu1 %64, %v17_v24  }
 0x180   :  { %v46_v25 = vpop.permute.xlu1 %45 }
 0x181   :  { %v48_v26 = vmul.f32 %v46_v25, %v22_v5  ;;  %v49_v27 = vmul.f32 %v46_v25, %v23_v6 }
 0x188   :  { %v53_v28 = vpop.permute.xlu1 %52 }
 0x189   :  { %v55_v29 = vadd.f32 %v53_v28, %v48_v26  ;;  %v56_v30 = vadd.f32 %v53_v28, %v49_v27 }
 0x18b   :  { %57 = vst [vmem:[%s110_s3] sm:$0xff] %v55_v29 }
 0x18c   :  { %58 = vst [vmem:[%s110_s3 + $0x8] sm:$0xff] %v56_v30 }

</bundles_post_ra>
